<compile_context>
chip_gen: v6e
topology: v6e:2x2x1
jax: 0.10.0
libtpu: 0.0.40
codegen_flags: <defaults>
</compile_context>

<pallas_src>
import jax
import jax.numpy as jnp
import numpy as np
from jax import lax
from jax.experimental import pallas as pl
from jax.experimental.pallas import tpu as pltpu


_VMEM_TILE_BUDGET = 12 * 1024 * 1024   # per-step (double-buffered) tile budget
_VMEM_LIMIT = 32 * 1024 * 1024         # scoped-VMEM limit: >= defaults on all
                                        # gens, <= v7x's 64 MiB physical per TC


def _round_up(a, b):
    return -(-a // b) * b


def _choose_d_tile(B, D, S, P, K, dtype,
                   budget_bytes=_VMEM_TILE_BUDGET, min_steps=4, max_tile=1024):
    """Pick the D-tile from the real (padded) VMEM layout of the blocks.

    Accounts for lane (128) and sublane (8 f32 / 16 bf16 / 32 int8) padding of
    the (S+1, P) input and (K, S) output tiles, double buffering of both
    pipelined blocks and one transposed (P, S) temporary.  The tile is then
    capped so the grid keeps >= min_steps iterations (megacore / multi-TC
    sharding), and a divisor of D (no ragged tail block) is preferred when one
    is within 2x of the budget-optimal tile.
    """
    itemsize = jnp.dtype(dtype).itemsize
    sub = {4: 8, 2: 16, 1: 32}.get(itemsize, 8)
    lane = 128
    in_bytes = _round_up(S + 1, sub) * _round_up(P, lane) * itemsize   # frames
    out_bytes = _round_up(K, sub) * _round_up(S, lane) * itemsize      # chunks
    tmp_bytes = _round_up(P, sub) * _round_up(S, lane) * itemsize      # transpose temp
    per_channel = 2 * (in_bytes + out_bytes) + tmp_bytes               # 2x = double buffer
    t = int(max(1, min(D, max_tile, budget_bytes // per_channel)))
    # Keep enough grid steps for megacore / 2-TensorCore sharding (v7x).
    while t > 1 and B * pl.cdiv(D, t) < min_steps:
        t -= 1
    # Prefer a divisor of D (no ragged tail) if one is within 2x of optimal.
    for cand in range(t, 0, -1):
        if D % cand == 0:
            if 2 * cand >= t:
                return cand
            break
    return t


def _make_seg_kernel(P, S, unroll=2):
    def seg_kernel(xf_ref, o_ref):
        # xf_ref: (1, tD, S+1, P)  hop-P frames of the padded signal (VMEM)
        # o_ref : (1, tD, K,  S)   K = 2P
        tD = xf_ref.shape[1]

        def body(d, carry):
            # rows k <  P of chunk s  <- frame s      (sublane offset 0)
            lo = xf_ref[0, d, 0:S, :]                       # (S, P)
            o_ref[0, d, 0:P, :] = jnp.transpose(lo, (1, 0))  # lane-dense (P, S)
            # rows k >= P of chunk s  <- frame s + 1  (sublane offset 1);
            # offset applied on the sublane axis BEFORE the transpose.
            hi = xf_ref[0, d, 1:S + 1, :]                   # (S, P)
            o_ref[0, d, P:2 * P, :] = jnp.transpose(hi, (1, 0))
            return carry

        lax.fori_loop(0, tD, body, 0, unroll=min(unroll, tD))

    return seg_kernel


def segmentation(x, K):
    """x: [B, D, L] -> (out [B, D, K, S], gap). Matches PyTorch Segmentation."""
    assert K % 2 == 0, "Segmentation kernel requires even K (50% overlap, K = 2*P)."
    B, D, L = x.shape
    P = K // 2
    gap = K - (P + L % K) % K          # 1 <= gap <= K (gap == K is legal)
    C = (L + gap + P) // K
    S = 2 * C
    itemsize = jnp.dtype(x.dtype).itemsize

    # Single zero-pad pass [P | x | gap + P]; exposed to XLA for fusion into
    # the pallas_call operand (allow_input_fusion) so it need not be
    # materialized as a separate HBM pass.  The reshape to the hop-P frames
    # view is a free bitcast of the contiguous padded buffer.
    xp = jnp.pad(x, ((0, 0), (0, 0), (P, P + gap)))        # (B, D, (S+1)*P)
    xf = xp.reshape(B, D, S + 1, P)    # xf[b, d, s, j] = padded[b, d, s*P + j]

    tD = _choose_d_tile(B, D, S, P, K, x.dtype)
    grid = (B, pl.cdiv(D, tD))         # ragged tail block handled by Pallas
    kernel = _make_seg_kernel(P, S)

    out = pl.pallas_call(
        kernel,
        out_shape=jax.ShapeDtypeStruct((B, D, K, S), x.dtype),
        grid=grid,
        in_specs=[pl.BlockSpec((1, tD, S + 1, P), lambda b, d: (b, d, 0, 0))],
        out_specs=pl.BlockSpec((1, tD, K, S), lambda b, d: (b, d, 0, 0)),
        compiler_params=pltpu.CompilerParams(
            dimension_semantics=("parallel", "parallel"),
            vmem_limit_bytes=_VMEM_LIMIT,
            allow_input_fusion=[True]),
        cost_estimate=pl.CostEstimate(
            flops=0,
            transcendentals=0,
            bytes_accessed=int(B * D * ((S + 1) * P + K * S) * itemsize)),
    )(xf)
    return out, gap


def segmentation_ref(x, K):
    """Direct NumPy port of the PyTorch forward, for verification."""
    x = np.asarray(x)
    B, D, L = x.shape
    P = K // 2
    gap = K - (P + L % K) % K
    xp = np.pad(x, ((0, 0), (0, 0), (P, P + gap)))
    i1 = xp[:, :, :-P].reshape(B, D, -1, K)
    i2 = xp[:, :, P:].reshape(B, D, -1, K)
    out = np.concatenate([i1, i2], axis=3).reshape(B, D, -1, K)
    out = out.transpose(0, 1, 3, 2)
    return out, gap


def _check(B, D, L, K, seed=0):
    x = jax.random.normal(jax.random.PRNGKey(seed), (B, D, L), dtype=jnp.float32)
    out, gap = segmentation(x, K)
    out = jax.block_until_ready(out)
    ref_out, ref_gap = segmentation_ref(x, K)
    assert gap == ref_gap, (gap, ref_gap)
    assert out.shape == ref_out.shape, (out.shape, ref_out.shape)
    np.testing.assert_allclose(np.asarray(out), ref_out, rtol=0, atol=0)


if __name__ == "__main__":
    # main demo case (small shapes)
    _check(B=2, D=4, L=16, K=8)
    # L % K != 0  (gap = 1)
    _check(B=2, D=6, L=19, K=8)
    # gap == K (full extra zero chunk, matches PyTorch)
    _check(B=1, D=4, L=12, K=8)
    # sublane-aligned hop (P = 8 for f32), many chunks
    _check(B=2, D=8, L=200, K=16)
    # D with no convenient divisor -> ragged tail block on the D-tile axis
    _check(B=2, D=5, L=37, K=8)
    print("KERNEL_OK")
</pallas_src>

<mosaic_0001>
module attributes {stable_mosaic.version = 11 : i64} {
  func.func @seg_kernel(%arg0: i32, %arg1: i32, %arg2: memref<1x2x7x4xf32, #tpu.memory_space<vmem>>, %arg3: memref<1x2x8x6xf32, #tpu.memory_space<vmem>>) attributes {dimension_semantics = [#tpu.dimension_semantics<parallel>, #tpu.dimension_semantics<parallel>], iteration_bounds = array<i64: 2, 2>, scalar_prefetch = 0 : i64, scratch_operands = 0 : i64, tpu.core_type = #tpu.core_type<tc>, window_params = [{transform_indices = @transform_0, window_bounds = array<i64: 1, 2, 7, 4>}, {transform_indices = @transform_1, window_bounds = array<i64: 1, 2, 8, 6>}]} {
    %c0_i32 = arith.constant 0 : i32
    %c0 = arith.constant 0 : index
    %0 = arith.index_cast %c0_i32 : i32 to index
    %c0_0 = arith.constant 0 : index
    %c0_1 = arith.constant 0 : index
    %1 = vector.load %arg2[%c0, %0, %c0_0, %c0_1] : memref<1x2x7x4xf32, #tpu.memory_space<vmem>>, vector<1x1x6x4xf32>
    %2 = vector.shape_cast %1 : vector<1x1x6x4xf32> to vector<6x4xf32>
    %3 = tpu.transpose %2, [1, 0] : vector<6x4xf32> -> vector<4x6xf32>
    %c0_2 = arith.constant 0 : index
    %4 = arith.index_cast %c0_i32 : i32 to index
    %c0_3 = arith.constant 0 : index
    %c0_4 = arith.constant 0 : index
    %5 = vector.load %arg3[%c0_2, %4, %c0_3, %c0_4] : memref<1x2x8x6xf32, #tpu.memory_space<vmem>>, vector<1x1x4x6xf32>
    %6 = vector.shape_cast %5 : vector<1x1x4x6xf32> to vector<4x6xf32>
    %7 = vector.shape_cast %3 : vector<4x6xf32> to vector<1x1x4x6xf32>
    tpu.vector_store %arg3[%c0_2, %4, %c0_3, %c0_4], %7 {strides = array<i32>} : memref<1x2x8x6xf32, #tpu.memory_space<vmem>>, vector<1x1x4x6xf32>,
    %c0_5 = arith.constant 0 : index
    %8 = arith.index_cast %c0_i32 : i32 to index
    %c1 = arith.constant 1 : index
    %c0_6 = arith.constant 0 : index
    %9 = vector.load %arg2[%c0_5, %8, %c1, %c0_6] : memref<1x2x7x4xf32, #tpu.memory_space<vmem>>, vector<1x1x6x4xf32>
    %10 = vector.shape_cast %9 : vector<1x1x6x4xf32> to vector<6x4xf32>
    %11 = tpu.transpose %10, [1, 0] : vector<6x4xf32> -> vector<4x6xf32>
    %c0_7 = arith.constant 0 : index
    %12 = arith.index_cast %c0_i32 : i32 to index
    %c4 = arith.constant 4 : index
    %c0_8 = arith.constant 0 : index
    %13 = vector.load %arg3[%c0_7, %12, %c4, %c0_8] : memref<1x2x8x6xf32, #tpu.memory_space<vmem>>, vector<1x1x4x6xf32>
    %14 = vector.shape_cast %13 : vector<1x1x4x6xf32> to vector<4x6xf32>
    %15 = vector.shape_cast %11 : vector<4x6xf32> to vector<1x1x4x6xf32>
    tpu.vector_store %arg3[%c0_7, %12, %c4, %c0_8], %15 {strides = array<i32>} : memref<1x2x8x6xf32, #tpu.memory_space<vmem>>, vector<1x1x4x6xf32>,
    %c1_i32 = arith.constant 1 : i32
    %c0_9 = arith.constant 0 : index
    %16 = arith.index_cast %c1_i32 : i32 to index
    %c0_10 = arith.constant 0 : index
    %c0_11 = arith.constant 0 : index
    %17 = vector.load %arg2[%c0_9, %16, %c0_10, %c0_11] : memref<1x2x7x4xf32, #tpu.memory_space<vmem>>, vector<1x1x6x4xf32>
    %18 = vector.shape_cast %17 : vector<1x1x6x4xf32> to vector<6x4xf32>
    %19 = tpu.transpose %18, [1, 0] : vector<6x4xf32> -> vector<4x6xf32>
    %c0_12 = arith.constant 0 : index
    %20 = arith.index_cast %c1_i32 : i32 to index
    %c0_13 = arith.constant 0 : index
    %c0_14 = arith.constant 0 : index
    %21 = vector.load %arg3[%c0_12, %20, %c0_13, %c0_14] : memref<1x2x8x6xf32, #tpu.memory_space<vmem>>, vector<1x1x4x6xf32>
    %22 = vector.shape_cast %21 : vector<1x1x4x6xf32> to vector<4x6xf32>
    %23 = vector.shape_cast %19 : vector<4x6xf32> to vector<1x1x4x6xf32>
    tpu.vector_store %arg3[%c0_12, %20, %c0_13, %c0_14], %23 {strides = array<i32>} : memref<1x2x8x6xf32, #tpu.memory_space<vmem>>, vector<1x1x4x6xf32>,
    %c0_15 = arith.constant 0 : index
    %24 = arith.index_cast %c1_i32 : i32 to index
    %c1_16 = arith.constant 1 : index
    %c0_17 = arith.constant 0 : index
    %25 = vector.load %arg2[%c0_15, %24, %c1_16, %c0_17] : memref<1x2x7x4xf32, #tpu.memory_space<vmem>>, vector<1x1x6x4xf32>
    %26 = vector.shape_cast %25 : vector<1x1x6x4xf32> to vector<6x4xf32>
    %27 = tpu.transpose %26, [1, 0] : vector<6x4xf32> -> vector<4x6xf32>
    %c0_18 = arith.constant 0 : index
    %28 = arith.index_cast %c1_i32 : i32 to index
    %c4_19 = arith.constant 4 : index
    %c0_20 = arith.constant 0 : index
    %29 = vector.load %arg3[%c0_18, %28, %c4_19, %c0_20] : memref<1x2x8x6xf32, #tpu.memory_space<vmem>>, vector<1x1x4x6xf32>
    %30 = vector.shape_cast %29 : vector<1x1x4x6xf32> to vector<4x6xf32>
    %31 = vector.shape_cast %27 : vector<4x6xf32> to vector<1x1x4x6xf32>
    tpu.vector_store %arg3[%c0_18, %28, %c4_19, %c0_20], %31 {strides = array<i32>} : memref<1x2x8x6xf32, #tpu.memory_space<vmem>>, vector<1x1x4x6xf32>,
    %c2_i32 = arith.constant 2 : i32
    return
  }
  func.func @transform_0(%arg0: i32, %arg1: i32) -> (i32, i32, i32, i32) {
    %c0_i32 = arith.constant 0 : i32
    %c0_i32_0 = arith.constant 0 : i32
    %c0_i32_1 = arith.constant 0 : i32
    return %arg0, %arg1, %c0_i32, %c0_i32_0 : i32, i32, i32, i32
  }
  func.func @transform_1(%arg0: i32, %arg1: i32) -> (i32, i32, i32, i32) {
    %c0_i32 = arith.constant 0 : i32
    %c0_i32_0 = arith.constant 0 : i32
    %c0_i32_1 = arith.constant 0 : i32
    return %arg0, %arg1, %c0_i32, %c0_i32_0 : i32, i32, i32, i32
  }
}

</mosaic_0001>

<bundles_post_ra>
// kernel: tpu_custom_call.1
= control target key start
LH: loop header
LB: loop body
LE: loop exit
PB: predicated region body
PF: predicated region fallthrough
CT: control target
= control target key end

     0   :  { %s493_s6 = smov 0   ;;  %s495_s7 = smov 0   ;;  %s544_s0 = inlined_call_operand.vmem [shape: f32[2,4,7,4], index: 0, kind: input, shape index: {}]   ;;  %s545_s1 = inlined_call_operand.vmem [shape: f32[2,4,8,6], index: 1, kind: output, shape index: {}]  }
   0x1   :  { %s497_s8 = smov 0   ;;  %s499_s9 = smov 0  }
   0x2   :  { %s501_s10 = smov 0  }
   0x3 LB: > { %s20_s11 = sadd.s32 1, %s473_s8  ;;  %s23_s12 = sadd.s32 1, %s477_s9  ;;  %s481_s10 = sphi %s501_s10, %s11_s10   ;;  %s477_s9 = sphi %s499_s9, %s549_s9   ;;  %s473_s8 = sphi %s497_s8, %s548_s8   ;;  %s469_s7 = sphi %s495_s7, %s547_s7   ;;  %s465_s6 = sphi %s493_s6, %s546_s6  }
   0x4   : > { %p21_p0 = scmp.ge.s32.totalorder %s20_s11, 2  ;;  %p389_p1 = scmp.ge.s32.totalorder %s481_s10, 1 }
   0x5   : > { %p108_p2 = scmp.lt.s32.totalorder %s481_s10, 5 }
   0x6   : > { %s551_s11 = smov (%p21_p0, %s20_s11), 0  ;;  %s553_s12 = smov (!%p21_p0, %s23_s12), %s477_s9 }
   0x7   : > { %p109_p3 = pnand %p389_p1, %p108_p2  ;;  %p25_p4 = scmp.ge.s32.totalorder %s553_s12, 2 }
   0x8   : > { %s390_s13 = sshll.u32 (!%p109_p3), %s465_s6, 1  ;;  %p137_p5 = scmp.lt.s32.totalorder (!%p109_p3), %s469_s7, 1 }
   0x9   : > { %s555_s12 = smov (%p25_p4, %s553_s12), 0  ;;  %112 = sbr.rel (%p109_p3) target bundleno = 150 (0x96), region = 24 }
   0xa   : > { %p139_p6 = scmp.lt.s32.totalorder (!%p109_p3), %s390_s13, 3 }
   0xe   : > { %s557_s7 = smov (!%p137_p5, %s469_s7), 1  ;;  %s559_s13 = smov (!%p139_p6, %s390_s13), 3  ;;  %vm189_vm0 = vcmask 44032  }
   0xf   : > { %s391_s14 = sshll.u32 %s557_s7, 2 }
  0x10   : > { %s142_s15 = sadd.s32 %s391_s14, %s559_s13 }
  0x11   : > { %s392_s16 = sshll.u32 %s142_s15, 3 }
  0x12   : > { %s144_s19 = scalar_lea.vmem %s544_s0, %s392_s16  ;;  %s154_s22 = scalar_lea.vmem %s545_s1, %s392_s16 }
  0x13   : > { %v396_v0 = vld [vmem:[%s144_s19 + $0x8] sm:$0x3f]  ;;  %v156_v1 = vld [vmem:[%s144_s19] sm:$0x3f] }
  0x14   : > { %227 = vxpose.xlu1.b32.start.end [1/1] (short) (narrow) %v396_v0, 8  ;;  %157 = vxpose.xlu0.b32.start.end [1/1] (short) (narrow) %v156_v1, 8  ;;  %v398_v2 = vld [vmem:[%s144_s19 + $0x9] sm:$0x3f]  ;;  %v191_v3 = vld [vmem:[%s144_s19 + $0x1] sm:$0x3f] }
  0x18   : > { %262 = vxpose.xlu1.b32.start.end [1/1] (short) (narrow) %v398_v2, 8  ;;  %192 = vxpose.xlu0.b32.start.end [1/1] (short) (narrow) %v191_v3, 8 }
  0x90   : > { %v243_v4 = vpop.trf.xlu1  ;;  %v173_v5 = vpop.trf.xlu0 }
  0x91   : > { %397 = vst.msk [vmem:[%s154_s22 + $0x8] sm:$0xf] %vm189_vm0, %v243_v4  ;;  %190 = vst.msk [vmem:[%s154_s22] sm:$0xf] %vm189_vm0, %v173_v5 }
  0x94   : > { %v278_v6 = vpop.trf.xlu1  ;;  %v208_v7 = vpop.trf.xlu0 }
  0x95   : > { %399 = vst.msk [vmem:[%s154_s22 + $0xc] sm:$0xf] %vm189_vm0, %v278_v6  ;;  %224 = vst.msk [vmem:[%s154_s22 + $0x4] sm:$0xf] %vm189_vm0, %v208_v7 }
  0x96 PF: > { %s11_s10 = sadd.s32 1, %s481_s10   ;;  %s546_s6 = smov %s473_s8 }
  0x97   : > { %p8_p7 = scmp.ge.s32.totalorder %s11_s10, 6   ;;  %s547_s7 = smov %s477_s9 }
  0x98   : > { %s548_s8 = smov %s551_s11  ;;  %s549_s9 = smov %s555_s12 }
  0x99   :  { %10 = sbr.rel (!%p8_p7) target bundleno = 3 (0x3), region = 56 }

</bundles_post_ra>
